<compile_context>
chip_gen: v5e
topology: v5e:2x2
jax: 0.10.0
libtpu: 0.0.40
codegen_flags: <defaults>
</compile_context>

<pallas_src>
import jax
import jax.numpy as jnp
from jax.experimental import pallas as pl
from jax.experimental.pallas import tpu as pltpu

_SQRT_2_OVER_PI = 0.7978845608028654


def _round_up(n, m):
    return ((n + m - 1) // m) * m


def _vmem_capacity_bytes():
    try:
        info = pltpu.get_tpu_info()
        cap = getattr(info, "vmem_capacity_bytes", None)
        if cap:
            return int(cap)
    except Exception:
        pass
    return 64 << 20  # conservative fallback (v7x per-TensorCore VMEM)


def mlp_forward(x, w_fc, b_fc, w_proj, b_proj, *, tm=256, tH=512,
                out_dtype=jnp.bfloat16):
    """Fused GPT-2 MLP forward.

    x:      (B, T, C) f32 (or bf16) activations.
    w_fc:   (C, H)  weight in (in, out) layout (ideally already bf16).
    b_fc:   (H,)    bias.
    w_proj: (H, C)  weight in (in, out) layout (ideally already bf16).
    b_proj: (C,)    bias.
    Returns (B, T, C) in `out_dtype`.
    """
    B, T, C = x.shape
    H = w_fc.shape[1]
    assert C % 128 == 0 and H % 128 == 0, "C and H must be lane-dense (multiples of 128)"

    M = B * T
    # Row tile: multiple of 16 (bf16 packs (16,128) per vreg); prefer 256 (MXU M on v6e/v7x).
    tm = min(tm, _round_up(M, 16))
    tm = _round_up(tm, 16)
    # Megacore (v7x): make sure both TensorCores get work when there is enough of it.
    while tm > 16 and pl.cdiv(M, tm) < 2:
        tm = _round_up(tm // 2, 16)
    grid_m = pl.cdiv(M, tm)

    # Hidden-dim chunk: 128-multiple dividing H (H = 4*C and C % 128 == 0 => 512 | H).
    tH = min(tH, H)
    assert H % tH == 0 and tH % 128 == 0, "tH must be a 128-multiple dividing H"
    n_chunks = H // tH

    # bf16 matmul operands; cast here only if the caller didn't already store bf16
    # (the cast should live outside the per-step computation).
    if w_fc.dtype != jnp.bfloat16:
        w_fc = w_fc.astype(jnp.bfloat16)
    if w_proj.dtype != jnp.bfloat16:
        w_proj = w_proj.astype(jnp.bfloat16)
    b_fc2 = b_fc.reshape(1, H).astype(jnp.float32)
    b_proj2 = b_proj.reshape(1, C).astype(jnp.float32)

    x2d = x.reshape(M, C)  # metadata-only reshape; no dtype/pad pass over HBM
    x_bytes = x2d.dtype.itemsize
    out_bytes = jnp.dtype(out_dtype).itemsize

    def kernel(x_ref, wfc_ref, bfc_ref, wproj_ref, bproj_ref, o_ref):
        # Cast the x tile to bf16 once per tile (hidden under the pipeline).
        xb = x_ref[...].astype(jnp.bfloat16)
        acc = jnp.zeros((x_ref.shape[0], C), jnp.float32)
        # Statically-unrolled H-chunk loop: matmul1 / GELU / matmul2 per slice so
        # GELU (VPU/EUP) overlaps the next chunk's MXU work.
        for k in range(n_chunks):
            lo = k * tH
            hi = lo + tH
            h = jnp.dot(xb, wfc_ref[:, lo:hi],
                        preferred_element_type=jnp.float32) + bfc_ref[:, lo:hi]
            # tanh-approx GELU (matches nn.GELU(approximate='tanh')), trimmed VALU chain.
            t = jnp.tanh(_SQRT_2_OVER_PI * h * (1.0 + 0.044715 * (h * h)))
            g = h * (0.5 + 0.5 * t)
            acc = acc + jnp.dot(g.astype(jnp.bfloat16), wproj_ref[lo:hi, :],
                                preferred_element_type=jnp.float32)
        o_ref[...] = (acc + bproj_ref[...]).astype(o_ref.dtype)

    # VMEM budget: resident bf16 weights (single-buffered) + double-buffered x/out
    # tiles + per-chunk f32 intermediates + headroom; capped by this chip's VMEM.
    weight_bytes = 2 * C * H * 2 + (H + C) * 4
    tile_bytes = (2 * tm * C * x_bytes          # x tile, double-buffered
                  + 2 * tm * C * out_bytes      # out tile, double-buffered
                  + 4 * tm * tH * 4             # h / g / temps for one chunk
                  + 2 * tm * C * 4)             # accumulator + bf16 copies slack
    vmem_cap = _vmem_capacity_bytes()
    vmem_limit = int(min(max(weight_bytes + tile_bytes + (8 << 20), 32 << 20),
                         vmem_cap - (4 << 20)))
    # TODO(synk): for very large MLPs on v7x (bf16 resident weights + tiles > ~56 MiB,
    # e.g. GPT-2 XL), switch to an H-streaming variant: trailing "arbitrary" grid axis,
    # w_fc blocked (C, tH) / w_proj blocked (tH, C) with default Buffered(2), and a
    # (tm, C) f32 scratch accumulator init/finalized under pl.when -- or fp8 weights.

    cost = pl.CostEstimate(
        flops=int(4 * M * C * H),          # two matmuls: 2*M*C*H each
        transcendentals=int(M * H),        # tanh in GELU
        bytes_accessed=int(M * C * (x_bytes + out_bytes) + weight_bytes),
    )

    out2d = pl.pallas_call(
        kernel,
        out_shape=jax.ShapeDtypeStruct((M, C), out_dtype),
        grid_spec=pltpu.PrefetchScalarGridSpec(
            num_scalar_prefetch=0,
            grid=(grid_m,),
            in_specs=[
                pl.BlockSpec((tm, C), lambda i: (i, 0)),     # x tile (double-buffered)
                pl.BlockSpec((C, H), lambda i: (0, 0),       # w_fc, resident
                             pipeline_mode=pl.Buffered(buffer_count=1)),
                pl.BlockSpec((1, H), lambda i: (0, 0),       # b_fc
                             pipeline_mode=pl.Buffered(buffer_count=1)),
                pl.BlockSpec((H, C), lambda i: (0, 0),       # w_proj, resident
                             pipeline_mode=pl.Buffered(buffer_count=1)),
                pl.BlockSpec((1, C), lambda i: (0, 0),       # b_proj
                             pipeline_mode=pl.Buffered(buffer_count=1)),
            ],
            out_specs=pl.BlockSpec((tm, C), lambda i: (i, 0)),
        ),
        compiler_params=pltpu.CompilerParams(
            dimension_semantics=("parallel",),
            vmem_limit_bytes=vmem_limit,
        ),
        cost_estimate=cost,
    )(x2d, w_fc, b_fc2, w_proj, b_proj2)

    return out2d.reshape(B, T, C)


if __name__ == "__main__":
    # Small lane-dense config consistent with the module: n_embd=128, hidden = 4*n_embd.
    B, T, C = 2, 8, 128
    H = 4 * C

    key = jax.random.PRNGKey(0)
    kx, k1, k2, k3, k4 = jax.random.split(key, 5)

    x = jax.random.normal(kx, (B, T, C), dtype=jnp.float32)
    # Deterministic synthetic parameters (nn.Linear-like scale), stored (in, out).
    w_fc_f32 = jax.random.normal(k1, (C, H), dtype=jnp.float32) * (1.0 / jnp.sqrt(C))
    b_fc = jax.random.normal(k2, (H,), dtype=jnp.float32) * 0.01
    w_proj_f32 = jax.random.normal(k3, (H, C), dtype=jnp.float32) * (1.0 / jnp.sqrt(H))
    b_proj = jax.random.normal(k4, (C,), dtype=jnp.float32) * 0.01
    # Cast weights to bf16 ONCE, outside the per-step forward.
    w_fc = w_fc_f32.astype(jnp.bfloat16)
    w_proj = w_proj_f32.astype(jnp.bfloat16)

    out = mlp_forward(x, w_fc, b_fc, w_proj, b_proj)
    jax.block_until_ready(out)

    # Also exercise the multi-chunk H loop (4 chunks of 128).
    out_chunked = mlp_forward(x, w_fc, b_fc, w_proj, b_proj, tH=128)
    jax.block_until_ready(out_chunked)

    # Reference in plain JAX (f32); bf16 matmul operands + bf16 output => loose tolerance.
    def ref(x):
        h = x @ w_fc_f32 + b_fc
        g = 0.5 * h * (1.0 + jnp.tanh(0.7978845608028654 * (h + 0.044715 * h ** 3)))
        return g @ w_proj_f32 + b_proj

    expected = ref(x)
    assert out.shape == (B, T, C) and out.dtype == jnp.bfloat16
    o32 = out.astype(jnp.float32)
    oc32 = out_chunked.astype(jnp.float32)
    assert jnp.allclose(o32, expected, atol=7.5e-2, rtol=7.5e-2), (
        float(jnp.max(jnp.abs(o32 - expected)))
    )
    assert jnp.allclose(oc32, expected, atol=7.5e-2, rtol=7.5e-2), (
        float(jnp.max(jnp.abs(oc32 - expected)))
    )

    print("KERNEL_OK")
</pallas_src>

<mosaic_0001>
module attributes {stable_mosaic.version = 11 : i64} {
  func.func @kernel(%arg0: i32, %arg1: memref<16x128xf32, #tpu.memory_space<vmem>>, %arg2: memref<128x512xbf16, #tpu.memory_space<vmem>>, %arg3: memref<1x512xf32, #tpu.memory_space<vmem>>, %arg4: memref<512x128xbf16, #tpu.memory_space<vmem>>, %arg5: memref<1x128xf32, #tpu.memory_space<vmem>>, %arg6: memref<16x128xbf16, #tpu.memory_space<vmem>>) attributes {dimension_semantics = [#tpu.dimension_semantics<parallel>], iteration_bounds = array<i64: 1>, scalar_prefetch = 0 : i64, scratch_operands = 0 : i64, tpu.core_type = #tpu.core_type<tc>, window_params = [{transform_indices = @transform_0, window_bounds = array<i64: 16, 128>}, {pipeline_mode = #tpu.pipeline_mode<synchronous>, transform_indices = @transform_1, window_bounds = array<i64: 128, 512>}, {pipeline_mode = #tpu.pipeline_mode<synchronous>, transform_indices = @transform_2, window_bounds = array<i64: 1, 512>}, {pipeline_mode = #tpu.pipeline_mode<synchronous>, transform_indices = @transform_3, window_bounds = array<i64: 512, 128>}, {pipeline_mode = #tpu.pipeline_mode<synchronous>, transform_indices = @transform_4, window_bounds = array<i64: 1, 128>}, {transform_indices = @transform_5, window_bounds = array<i64: 16, 128>}]} {
    %c0 = arith.constant 0 : index
    %c0_0 = arith.constant 0 : index
    %0 = vector.load %arg1[%c0, %c0_0] : memref<16x128xf32, #tpu.memory_space<vmem>>, vector<16x128xf32>
    %1 = arith.truncf %0 : vector<16x128xf32> to vector<16x128xbf16>
    %cst = arith.constant 0.000000e+00 : f32
    %2 = vector.broadcast %cst : f32 to vector<16x128xf32>
    %c0_1 = arith.constant 0 : index
    %c0_2 = arith.constant 0 : index
    %3 = vector.load %arg2[%c0_1, %c0_2] : memref<128x512xbf16, #tpu.memory_space<vmem>>, vector<128x512xbf16>
    %cst_3 = arith.constant dense<0.000000e+00> : vector<16x512xf32>
    %4 = tpu.matmul %1, %3, %cst_3 {dimension_numbers = #tpu.dot_dimension_numbers<[1], [0], [0], [1], [0, 0, 1, 1], [], []>} : vector<16x128xbf16>, vector<128x512xbf16>, vector<16x512xf32> -> vector<16x512xf32>
    %c0_4 = arith.constant 0 : index
    %c0_5 = arith.constant 0 : index
    %5 = vector.load %arg3[%c0_4, %c0_5] : memref<1x512xf32, #tpu.memory_space<vmem>>, vector<1x512xf32>
    %6 = vector.broadcast %5 : vector<1x512xf32> to vector<16x512xf32>
    %7 = arith.addf %4, %6 : vector<16x512xf32>
    %cst_6 = arith.constant 0.797884583 : f32
    %8 = vector.broadcast %cst_6 : f32 to vector<16x512xf32>
    %9 = arith.mulf %8, %7 : vector<16x512xf32>
    %10 = arith.mulf %7, %7 : vector<16x512xf32>
    %cst_7 = arith.constant 4.471500e-02 : f32
    %11 = vector.broadcast %cst_7 : f32 to vector<16x512xf32>
    %12 = arith.mulf %11, %10 : vector<16x512xf32>
    %cst_8 = arith.constant 1.000000e+00 : f32
    %13 = vector.broadcast %cst_8 : f32 to vector<16x512xf32>
    %14 = arith.addf %13, %12 : vector<16x512xf32>
    %15 = arith.mulf %9, %14 : vector<16x512xf32>
    %16 = math.tanh %15 : vector<16x512xf32>
    %cst_9 = arith.constant 5.000000e-01 : f32
    %17 = vector.broadcast %cst_9 : f32 to vector<16x512xf32>
    %18 = arith.mulf %17, %16 : vector<16x512xf32>
    %cst_10 = arith.constant 5.000000e-01 : f32
    %19 = vector.broadcast %cst_10 : f32 to vector<16x512xf32>
    %20 = arith.addf %19, %18 : vector<16x512xf32>
    %21 = arith.mulf %7, %20 : vector<16x512xf32>
    %22 = arith.truncf %21 : vector<16x512xf32> to vector<16x512xbf16>
    %c0_11 = arith.constant 0 : index
    %c0_12 = arith.constant 0 : index
    %23 = vector.load %arg4[%c0_11, %c0_12] : memref<512x128xbf16, #tpu.memory_space<vmem>>, vector<512x128xbf16>
    %cst_13 = arith.constant dense<0.000000e+00> : vector<16x128xf32>
    %24 = tpu.matmul %22, %23, %cst_13 {dimension_numbers = #tpu.dot_dimension_numbers<[1], [0], [0], [1], [0, 0, 1, 1], [], []>} : vector<16x512xbf16>, vector<512x128xbf16>, vector<16x128xf32> -> vector<16x128xf32>
    %25 = arith.addf %2, %24 : vector<16x128xf32>
    %c0_14 = arith.constant 0 : index
    %c0_15 = arith.constant 0 : index
    %26 = vector.load %arg5[%c0_14, %c0_15] : memref<1x128xf32, #tpu.memory_space<vmem>>, vector<1x128xf32>
    %27 = vector.broadcast %26 : vector<1x128xf32> to vector<16x128xf32>
    %28 = arith.addf %25, %27 : vector<16x128xf32>
    %29 = arith.truncf %28 : vector<16x128xf32> to vector<16x128xbf16>
    %c0_16 = arith.constant 0 : index
    %c0_17 = arith.constant 0 : index
    %30 = vector.load %arg6[%c0_16, %c0_17] : memref<16x128xbf16, #tpu.memory_space<vmem>>, vector<16x128xbf16>
    tpu.vector_store %arg6[%c0_16, %c0_17], %29 {strides = array<i32>} : memref<16x128xbf16, #tpu.memory_space<vmem>>, vector<16x128xbf16>,
    return
  }
  func.func @transform_0(%arg0: i32) -> (i32, i32) {
    %c0_i32 = arith.constant 0 : i32
    %c0_i32_0 = arith.constant 0 : i32
    return %arg0, %c0_i32 : i32, i32
  }
  func.func @transform_1(%arg0: i32) -> (i32, i32) {
    %c0_i32 = arith.constant 0 : i32
    %c0_i32_0 = arith.constant 0 : i32
    %c0_i32_1 = arith.constant 0 : i32
    return %c0_i32, %c0_i32_0 : i32, i32
  }
  func.func @transform_2(%arg0: i32) -> (i32, i32) {
    %c0_i32 = arith.constant 0 : i32
    %c0_i32_0 = arith.constant 0 : i32
    %c0_i32_1 = arith.constant 0 : i32
    return %c0_i32, %c0_i32_0 : i32, i32
  }
  func.func @transform_3(%arg0: i32) -> (i32, i32) {
    %c0_i32 = arith.constant 0 : i32
    %c0_i32_0 = arith.constant 0 : i32
    %c0_i32_1 = arith.constant 0 : i32
    return %c0_i32, %c0_i32_0 : i32, i32
  }
  func.func @transform_4(%arg0: i32) -> (i32, i32) {
    %c0_i32 = arith.constant 0 : i32
    %c0_i32_0 = arith.constant 0 : i32
    %c0_i32_1 = arith.constant 0 : i32
    return %c0_i32, %c0_i32_0 : i32, i32
  }
  func.func @transform_5(%arg0: i32) -> (i32, i32) {
    %c0_i32 = arith.constant 0 : i32
    %c0_i32_0 = arith.constant 0 : i32
    return %arg0, %c0_i32 : i32, i32
  }
}

</mosaic_0001>

<bundles_post_ra>
// kernel: tpu_custom_call.1
= control target key start
LH: loop header
LB: loop body
LE: loop exit
PB: predicated region body
PF: predicated region fallthrough
CT: control target
= control target key end

     0   :  { %10 = vsyncpa [#allocation3], 0  ;;  %s1342_s0 = inlined_call_operand.hbm [shape: f32[16,128], index: 0, kind: input, shape index: {}]   ;;  %s1343_s1 = inlined_call_operand.hbm [shape: bf16[128,512], index: 1, kind: input, shape index: {}]   ;;  %s1344_s2 = inlined_call_operand.hbm [shape: f32[1,512], index: 2, kind: input, shape index: {}]   ;;  %s1345_s3 = inlined_call_operand.hbm [shape: bf16[512,128], index: 3, kind: input, shape index: {}]   ;;  %s1346_s4 = inlined_call_operand.vmem [shape: f32[1,128], index: 4, kind: input, shape index: {}]   ;;  %s1347_s5 = inlined_call_operand.hbm [shape: bf16[16,128], index: 5, kind: output, shape index: {}]  }
   0x1   :  { %11 = vsyncpa [#allocation6], 0 }
   0x2   :  { %12 = vsyncpa [#allocation9], 0  ;;  %s31_s20 = sshll.u32 %s1343_s1, 4  ;;  %s32_s20 = int_to_ptr.hbm [resolvable:$true] %s31_s20 }
   0x3   :  { %13 = vsyncpa [#allocation4], 0  ;;  %s1241_s21 = smov [#allocation5]   ;;  %s18_s25 = sshll.u32 %s1342_s0, 4  ;;  %s19_s25 = int_to_ptr.hbm [resolvable:$true] %s18_s25 }
   0x4   :  { %s33_s22 = sshll.u32 %s1241_s21, 4  ;;  %s1242_s26 = smov 256   ;;  %s34_s22 = int_to_ptr.vmem [resolvable:$true] %s33_s22 }
   0x5   :  { %s1243_s27 = smov 16   ;;  %s1244_s28 = smov [#allocation2]  }
   0x6   :  { %39 = dma.hbm_to_vmem [thread:$0]  %s32_s20, 4096, %s34_s22, [#allocation6], %s1242_s26, %s1242_s26, %s1243_s27  }
   0x7   :  { %s20_s29 = sshll.u32 %s1244_s28, 4  ;;  %s1245_s30 = smov 128   ;;  %s21_s29 = int_to_ptr.vmem [resolvable:$true] %s20_s29 }
   0x8   :  { %s1246_s6 = smov 8   ;;  %s45_s8 = sshll.u32 %s1344_s2, 4  ;;  %s46_s8 = int_to_ptr.hbm [resolvable:$true] %s45_s8 }
   0x9   :  { %26 = dma.hbm_to_vmem [thread:$0]  %s19_s25, 256, %s21_s29, [#allocation3], %s1245_s30, %s1245_s30, %s1246_s6  }
   0xa   :  { %s1247_s9 = smov [#allocation7]   ;;  %s55_s12 = sshll.u32 %s1345_s3, 4  ;;  %s56_s12 = int_to_ptr.hbm [resolvable:$true] %s55_s12 }
   0xb   :  { %s47_s10 = sshll.u32 %s1247_s9, 4  ;;  %s1248_s13 = smov [#allocation8]   ;;  %s48_s10 = int_to_ptr.vmem [resolvable:$true] %s47_s10 }
   0xc   :  { %50 = dma.hbm_to_vmem [thread:$0]  %s46_s8, 64, %s48_s10, [#allocation6]  }
   0xd   :  { %s57_s14 = sshll.u32 %s1248_s13, 4  ;;  %s1249_s15 = smov 64   ;;  %s58_s14 = int_to_ptr.vmem [resolvable:$true] %s57_s14 }
   0xe   :  { %s1250_s16 = smov 4  }
   0xf   :  { %63 = dma.hbm_to_vmem [thread:$0]  %s56_s12, 4096, %s58_s14, [#allocation9], %s1249_s15, %s1249_s15, %s1250_s16  }
  0x10   :  { %1233 = dma.done.wait [#allocation3], 256  }
  0x11   :  { %1234 = vsyncadd [#allocation3], 4294967040 }
  0x12   :  { %1235 = dma.done.wait [#allocation6], 4160  }
  0x13   :  { %1236 = vsyncadd [#allocation6], 4294963136 }
  0x14   :  { %1237 = dma.done.wait [#allocation9], 4096  }
  0x15   :  { %1238 = vsyncadd [#allocation9], 4294963200  ;;  %v874_v0 = vld [vmem:[#allocation5 + $0xe0] sm:$0xf]  ;;  %v1046_v1 = vld [vmem:[#allocation5 + $0xec] sm:$0xf0] }
  0x16   :  { %v1044_v2 = vld [vmem:[#allocation5 + $0xe4] sm:$0xf]  ;;  %v875_v3 = vor.u32 %v1046_v1, %v874_v0  ;;  %v876_v4 = vld [vmem:[#allocation5 + $0xf0] sm:$0xf0]  ;;  %v882_v5 = vld [vmem:[#allocation5 + $0xe8] sm:$0xf] }
  0x17   :  { %v1047_v6 = vld [vmem:[#allocation5 + $0xf4] sm:$0xf0]  ;;  %v879_v7 = vor.u32 %v1044_v2, %v876_v4  ;;  %v1045_v9 = vld [vmem:[#allocation5 + $0xec] sm:$0xf]  ;;  %v884_v10 = vld [vmem:[#allocation5 + $0xf8] sm:$0xf0] }
  0x18   :  { %v883_v8 = vor.u32 %v1047_v6, %v882_v5  ;;  %v858_v11 = vld [vmem:[#allocation5 + $0xc0] sm:$0xf]  ;;  %287 = vmatpush.bf16.msra.mxu0 %v875_v3  ;;  %v887_v12 = vor.u32 %v1045_v9, %v884_v10  ;;  %v1042_v13 = vld [vmem:[#allocation5 + $0xcc] sm:$0xf0]  ;;  %v1040_v14 = vld [vmem:[#allocation5 + $0xc4] sm:$0xf] }
  0x19   :  { %v860_v15 = vld [vmem:[#allocation5 + $0xd0] sm:$0xf0]  ;;  %301 = vmatpush.bf16.msra.mxu1 %v879_v7  ;;  %v859_v16 = vor.u32 %v1042_v13, %v858_v11  ;;  %v866_v18 = vld [vmem:[#allocation5 + $0xc8] sm:$0xf]  ;;  %v1043_v19 = vld [vmem:[#allocation5 + $0xd4] sm:$0xf0] }
  0x1a   :  { %315 = vmatpush.bf16.msra.mxu2 %v883_v8  ;;  %v863_v17 = vor.u32 %v1040_v14, %v860_v15  ;;  %v1041_v20 = vld [vmem:[#allocation5 + $0xcc] sm:$0xf]  ;;  %329 = vmatpush.bf16.msra.mxu3 %v887_v12  ;;  %v867_v21 = vor.u32 %v1043_v19, %v866_v18  ;;  %v868_v22 = vld [vmem:[#allocation5 + $0xd8] sm:$0xf0]  ;;  %v842_v23 = vld [vmem:[#allocation5 + $0xa0] sm:$0xf] }
  0x1b   :  { %v1038_v24 = vld [vmem:[#allocation5 + $0xac] sm:$0xf0]  ;;  %v871_v25 = vor.u32 %v1041_v20, %v868_v22  ;;  %v1036_v26 = vld [vmem:[#allocation5 + $0xa4] sm:$0xf]  ;;  %v844_v27 = vld [vmem:[#allocation5 + $0xb0] sm:$0xf0] }
  0x1c   :  { %v850_v28 = vld [vmem:[#allocation5 + $0xa8] sm:$0xf]  ;;  %288 = vmatpush.bf16.msra.mxu0 %v859_v16  ;;  %v843_v29 = vor.u32 %v1038_v24, %v842_v23  ;;  %v1039_v30 = vld [vmem:[#allocation5 + $0xb4] sm:$0xf0]  ;;  %v1037_v31 = vld [vmem:[#allocation5 + $0xac] sm:$0xf]  ;;  %v847_v33 = vor.u32 %v1036_v26, %v844_v27 }
  0x1d   :  { %v852_v32 = vld [vmem:[#allocation5 + $0xb8] sm:$0xf0]  ;;  %302 = vmatpush.bf16.msra.mxu1 %v863_v17  ;;  %v851_v34 = vor.u32 %v1039_v30, %v850_v28  ;;  %v826_v35 = vld [vmem:[#allocation5 + $0x80] sm:$0xf]  ;;  %v1034_v36 = vld [vmem:[#allocation5 + $0x8c] sm:$0xf0] }
  0x1e   :  { %316 = vmatpush.bf16.msra.mxu2 %v867_v21  ;;  %v1032_v37 = vld [vmem:[#allocation5 + $0x84] sm:$0xf]  ;;  %330 = vmatpush.bf16.msra.mxu3 %v871_v25  ;;  %v855_v38 = vor.u32 %v1037_v31, %v852_v32  ;;  %v828_v39 = vld [vmem:[#allocation5 + $0x90] sm:$0xf0]  ;;  %v834_v40 = vld [vmem:[#allocation5 + $0x88] sm:$0xf]  ;;  %v827_v44 = vor.u32 %v1034_v36, %v826_v35 }
  0x1f   :  { %v1035_v41 = vld [vmem:[#allocation5 + $0x94] sm:$0xf0]  ;;  %v1033_v42 = vld [vmem:[#allocation5 + $0x8c] sm:$0xf]  ;;  %v836_v43 = vld [vmem:[#allocation5 + $0x98] sm:$0xf0]  ;;  %v831_v45 = vor.u32 %v1032_v37, %v828_v39 }
  0x20   :  { %289 = vmatpush.bf16.msra.mxu0 %v843_v29  ;;  %v835_v46 = vor.u32 %v1035_v41, %v834_v40  ;;  %v810_v47 = vld [vmem:[#allocation5 + $0x60] sm:$0xf]  ;;  %v1030_v48 = vld [vmem:[#allocation5 + $0x6c] sm:$0xf0]  ;;  %v1028_v49 = vld [vmem:[#allocation5 + $0x64] sm:$0xf]  ;;  %v839_v50 = vor.u32 %v1033_v42, %v836_v43 }
  0x21   :  { %303 = vmatpush.bf16.msra.mxu1 %v847_v33  ;;  %v812_v51 = vld [vmem:[#allocation5 + $0x70] sm:$0xf0]  ;;  %v818_v52 = vld [vmem:[#allocation5 + $0x68] sm:$0xf]  ;;  %v1031_v53 = vld [vmem:[#allocation5 + $0x74] sm:$0xf0]  ;;  %v811_v56 = vor.u32 %v1030_v48, %v810_v47 }
  0x22   :  { %317 = vmatpush.bf16.msra.mxu2 %v851_v34  ;;  %331 = vmatpush.bf16.msra.mxu3 %v855_v38  ;;  %v1029_v54 = vld [vmem:[#allocation5 + $0x6c] sm:$0xf]  ;;  %v820_v55 = vld [vmem:[#allocation5 + $0x78] sm:$0xf0]  ;;  %v815_v57 = vor.u32 %v1028_v49, %v812_v51  ;;  %v819_v58 = vor.u32 %v1031_v53, %v818_v52  ;;  %v794_v59 = vld [vmem:[#allocation5 + $0x40] sm:$0xf] }
  0x23   :  { %v1026_v60 = vld [vmem:[#allocation5 + $0x4c] sm:$0xf0]  ;;  %v1024_v61 = vld [vmem:[#allocation5 + $0x44] sm:$0xf]  ;;  %v823_v62 = vor.u32 %v1029_v54, %v820_v55  ;;  %v796_v63 = vld [vmem:[#allocation5 + $0x50] sm:$0xf0] }
  0x24   :  { %290 = vmatpush.bf16.msra.mxu0 %v827_v44  ;;  %v802_v0 = vld [vmem:[#allocation5 + $0x48] sm:$0xf]  ;;  %v1027_v1 = vld [vmem:[#allocation5 + $0x54] sm:$0xf0]  ;;  %v1025_v2 = vld [vmem:[#allocation5 + $0x4c] sm:$0xf]  ;;  %v795_v4 = vor.u32 %v1026_v60, %v794_v59  ;;  %v799_v5 = vor.u32 %v1024_v61, %v796_v63 }
  0x25   :  { %304 = vmatpush.bf16.msra.mxu1 %v831_v45  ;;  %v804_v3 = vld [vmem:[#allocation5 + $0x58] sm:$0xf0]  ;;  %v803_v6 = vor.u32 %v1027_v1, %v802_v0  ;;  %v778_v7 = vld [vmem:[#allocation5 + $0x20] sm:$0xf]  ;;  %v1022_v8 = vld [vmem:[#allocation5 + $0x2c] sm:$0xf0] }
  0x26   :  { %318 = vmatpush.bf16.msra.mxu2 %v835_v46  ;;  %332 = vmatpush.bf16.msra.mxu3 %v839_v50  ;;  %v1020_v9 = vld [vmem:[#allocation5 + $0x24] sm:$0xf]  ;;  %v807_v10 = vor.u32 %v1025_v2, %v804_v3  ;;  %v780_v11 = vld [vmem:[#allocation5 + $0x30] sm:$0xf0]  ;;  %v786_v12 = vld [vmem:[#allocation5 + $0x28] sm:$0xf]  ;;  %v779_v16 = vor.u32 %v1022_v8, %v778_v7 }
  0x27   :  { %v1023_v13 = vld [vmem:[#allocation5 + $0x34] sm:$0xf0]  ;;  %v1021_v14 = vld [vmem:[#allocation5 + $0x2c] sm:$0xf]  ;;  %v788_v15 = vld [vmem:[#allocation5 + $0x38] sm:$0xf0]  ;;  %v783_v17 = vor.u32 %v1020_v9, %v780_v11 }
  0x28   :  { %291 = vmatpush.bf16.msra.mxu0 %v811_v56  ;;  %v787_v18 = vor.u32 %v1023_v13, %v786_v12  ;;  %v762_v19 = vld [vmem:[#allocation5] sm:$0xf]  ;;  %v1018_v20 = vld [vmem:[#allocation5 + $0xc] sm:$0xf0]  ;;  %v1016_v21 = vld [vmem:[#allocation5 + $0x4] sm:$0xf]  ;;  %v791_v22 = vor.u32 %v1021_v14, %v788_v15 }
  0x29   :  { %305 = vmatpush.bf16.msra.mxu1 %v815_v57  ;;  %v764_v23 = vld [vmem:[#allocation5 + $0x10] sm:$0xf0]  ;;  %v770_v24 = vld [vmem:[#allocation5 + $0x8] sm:$0xf]  ;;  %v1019_v25 = vld [vmem:[#allocation5 + $0x14] sm:$0xf0]  ;;  %v763_v28 = vor.u32 %v1018_v20, %v762_v19 }
  0x2a   :  { %319 = vmatpush.bf16.msra.mxu2 %v819_v58  ;;  %333 = vmatpush.bf16.msra.mxu3 %v823_v62  ;;  %v1017_v26 = vld [vmem:[#allocation5 + $0xc] sm:$0xf]  ;;  %v772_v27 = vld [vmem:[#allocation5 + $0x18] sm:$0xf0]  ;;  %v82_v29 = vld [vmem:[#allocation2] sm:$0xff]  ;;  %v767_v31 = vor.u32 %v1016_v21, %v764_v23  ;;  %v771_v32 = vor.u32 %v1019_v25, %v770_v24  ;;  %s1251_s17 = smov [#allocation10]  }
  0x2b   :  { %v83_v30 = vld [vmem:[#allocation2 + $0x8] sm:$0xff]  ;;  %v775_v33 = vor.u32 %v1017_v26, %v772_v27  ;;  %v1053_v41 = vld [vmem:[#allocation8 + $0x28] sm:$0xff]  ;;  %v1052_v45 = vld [vmem:[#allocation8 + $0x20] sm:$0xff]  ;;  %s743_s18 = sshll.u32 %s1251_s17, 4  ;;  %s745_s21 = sshll.u32 %s1347_s5, 4  ;;  %s744_s18 = int_to_ptr.vmem [resolvable:$true] %s743_s18  ;;  %s746_s21 = int_to_ptr.hbm [resolvable:$true] %s745_s21 }
  0x2c   :  { %292 = vmatpush.bf16.msra.mxu0 %v795_v4  ;;  %v84_v34 = vpack.c.bf16 %v83_v30, %v82_v29  ;;  %v1055_v35 = vld [vmem:[#allocation8 + $0x38] sm:$0xff]  ;;  %v1054_v37 = vld [vmem:[#allocation8 + $0x30] sm:$0xff]  ;;  %v1061_v42 = vld [vmem:[#allocation8 + $0x68] sm:$0xff] }
  0x2d   :  { %306 = vmatpush.bf16.msra.mxu1 %v799_v5  ;;  %v1063_v36 = vld [vmem:[#allocation8 + $0x78] sm:$0xff]  ;;  %v1062_v38 = vld [vmem:[#allocation8 + $0x70] sm:$0xff]  ;;  %v1060_v46 = vld [vmem:[#allocation8 + $0x60] sm:$0xff] }
  0x2e   :  { %320 = vmatpush.bf16.msra.mxu2 %v803_v6  ;;  %334 = vmatpush.bf16.msra.mxu3 %v807_v10  ;;  %v1071_v39 = vld [vmem:[#allocation8 + $0xb8] sm:$0xff]  ;;  %v1070_v43 = vld [vmem:[#allocation8 + $0xb0] sm:$0xff]  ;;  %v1069_v47 = vld [vmem:[#allocation8 + $0xa8] sm:$0xff] }
  0x2f   :  { %v1079_v40 = vld [vmem:[#allocation8 + $0xf8] sm:$0xff]  ;;  %v1078_v44 = vld [vmem:[#allocation8 + $0xf0] sm:$0xff]  ;;  %v1077_v48 = vld [vmem:[#allocation8 + $0xe8] sm:$0xff] }
  0x30   :  { %293 = vmatpush.bf16.msra.mxu0 %v779_v16  ;;  %v1051_v49 = vld [vmem:[#allocation8 + $0x18] sm:$0xff]  ;;  %v1068_v51 = vld [vmem:[#allocation8 + $0xa0] sm:$0xff]  ;;  %v1050_v53 = vld [vmem:[#allocation8 + $0x10] sm:$0xff] }
  0x31   :  { %307 = vmatpush.bf16.msra.mxu1 %v783_v17  ;;  %v1059_v50 = vld [vmem:[#allocation8 + $0x58] sm:$0xff]  ;;  %v1076_v52 = vld [vmem:[#allocation8 + $0xe0] sm:$0xff]  ;;  %v1058_v54 = vld [vmem:[#allocation8 + $0x50] sm:$0xff] }
  0x32   :  { %321 = vmatpush.bf16.msra.mxu2 %v787_v18  ;;  %335 = vmatpush.bf16.msra.mxu3 %v791_v22  ;;  %v1297_v55 = vld [vmem:[#allocation7] sm:$0xf]  ;;  %v1049_v58 = vld [vmem:[#allocation8 + $0x8] sm:$0xff]  ;;  %v1066_v62 = vld [vmem:[#allocation8 + $0x90] sm:$0xff] }
  0x33   :  { %v1067_v56 = vld [vmem:[#allocation8 + $0x98] sm:$0xff]  ;;  %v1057_v59 = vld [vmem:[#allocation8 + $0x48] sm:$0xff]  ;;  %v119_v60 = vperm.slane %v1297_v55, 0  ;;  %v120_v61 = vperm.slane %v1297_v55, 1  ;;  %v1074_v63 = vld [vmem:[#allocation8 + $0xd0] sm:$0xff]  ;;  %v121_v10 = vperm.slane %v1297_v55, 2 }
  0x34   :  { %294 = vmatpush.bf16.msra.mxu0 %v763_v28  ;;  %v1075_v57 = vld [vmem:[#allocation8 + $0xd8] sm:$0xff]  ;;  %v1048_v1 = vld [vmem:[#allocation8] sm:$0xff]  ;;  %v1065_v6 = vld [vmem:[#allocation8 + $0x88] sm:$0xff]  ;;  %v122_v12 = vperm.slane %v1297_v55, 3 }
  0x35   :  { %308 = vmatpush.bf16.msra.mxu1 %v767_v31  ;;  %v1056_v2 = vld [vmem:[#allocation8 + $0x40] sm:$0xff]  ;;  %v1073_v7 = vld [vmem:[#allocation8 + $0xc8] sm:$0xff] }
  0x36   :  { %322 = vmatpush.bf16.msra.mxu2 %v771_v32  ;;  %336 = vmatpush.bf16.msra.mxu3 %v775_v33  ;;  %v1064_v15 = vld [vmem:[#allocation8 + $0x80] sm:$0xff] }
  0x37   :  { %295 = vmatmul.bf16.vlgmr.msra.gmra.mxu0 %v84_v34  ;;  %v1072_v16 = vld [vmem:[#allocation8 + $0xc0] sm:$0xff] }
  0x38   :  { %309 = vmatmul.bf16.vlgmr.msra.gmra.mxu1 %v84_v34  ;;  %679 = vmatpush.bf16.msrb.mxu0 %v1055_v35 }
  0x39   :  { %323 = vmatmul.bf16.vlgmr.msra.gmra.mxu2 %v84_v34  ;;  %337 = vmatmul.bf16.vlgmr.msra.gmra.mxu3 %v84_v34 }
  0x3a   :  { %693 = vmatpush.bf16.msrb.mxu1 %v1063_v36  ;;  %707 = vmatpush.bf16.msrb.mxu2 %v1071_v39 }
  0x3b   :  { %721 = vmatpush.bf16.msrb.mxu3 %v1079_v40 }
  0x3c   :  { %680 = vmatpush.bf16.msrb.mxu0 %v1054_v37 }
  0x3e   :  { %694 = vmatpush.bf16.msrb.mxu1 %v1062_v38  ;;  %708 = vmatpush.bf16.msrb.mxu2 %v1070_v43 }
  0x3f   :  { %722 = vmatpush.bf16.msrb.mxu3 %v1078_v44 }
  0x40   :  { %681 = vmatpush.bf16.msrb.mxu0 %v1053_v41 }
  0x42   :  { %695 = vmatpush.bf16.msrb.mxu1 %v1061_v42  ;;  %709 = vmatpush.bf16.msrb.mxu2 %v1069_v47 }
  0x43   :  { %723 = vmatpush.bf16.msrb.mxu3 %v1077_v48 }
  0x44   :  { %682 = vmatpush.bf16.msrb.mxu0 %v1052_v45 }
  0x46   :  { %696 = vmatpush.bf16.msrb.mxu1 %v1060_v46  ;;  %710 = vmatpush.bf16.msrb.mxu2 %v1068_v51 }
  0x47   :  { %724 = vmatpush.bf16.msrb.mxu3 %v1076_v52 }
  0x48   :  { %683 = vmatpush.bf16.msrb.mxu0 %v1051_v49 }
  0x4a   :  { %697 = vmatpush.bf16.msrb.mxu1 %v1059_v50  ;;  %711 = vmatpush.bf16.msrb.mxu2 %v1067_v56 }
  0x4b   :  { %725 = vmatpush.bf16.msrb.mxu3 %v1075_v57 }
  0x4c   :  { %684 = vmatpush.bf16.msrb.mxu0 %v1050_v53 }
  0x4e   :  { %698 = vmatpush.bf16.msrb.mxu1 %v1058_v54  ;;  %712 = vmatpush.bf16.msrb.mxu2 %v1066_v62 }
  0x4f   :  { %726 = vmatpush.bf16.msrb.mxu3 %v1074_v63 }
  0x50   :  { %685 = vmatpush.bf16.msrb.mxu0 %v1049_v58 }
  0x52   :  { %699 = vmatpush.bf16.msrb.mxu1 %v1057_v59  ;;  %713 = vmatpush.bf16.msrb.mxu2 %v1065_v6 }
  0x53   :  { %727 = vmatpush.bf16.msrb.mxu3 %v1073_v7 }
  0x54   :  { %686 = vmatpush.bf16.msrb.mxu0 %v1048_v1 }
  0x56   :  { %700 = vmatpush.bf16.msrb.mxu1 %v1056_v2  ;;  %714 = vmatpush.bf16.msrb.mxu2 %v1064_v15 }
  0x57   :  { %728 = vmatpush.bf16.msrb.mxu3 %v1072_v16 }
  0xb4   :  { %v296_v0 = vpop.f32.mrf.mxu0 }
  0xb5   :  { %v1301_v3 = vadd.f32 %v296_v0, %v119_v60  ;;  %v310_v4 = vpop.f32.mrf.mxu1 }
  0xb6   :  { %v1303_v5 = vadd.f32 %v310_v4, %v120_v61 }
  0xb7   :  { %v351_v8 = vmul.f32 %v1301_v3, %v1301_v3  ;;  %v343_v13 = vmul.f32 0.7978846, %v1301_v3 }
  0xb8   :  { %v352_v9 = vmul.f32 %v1303_v5, %v1303_v5  ;;  %v344_v18 = vmul.f32 0.7978846, %v1303_v5 }
  0xb9   :  { %v359_v11 = vmul.f32 0.044715, %v351_v8 }
  0xba   :  { %v360_v14 = vmul.f32 0.044715, %v352_v9 }
  0xbb   :  { %v367_v17 = vadd.f32 1.0, %v359_v11 }
  0xbc   :  { %v324_v19 = vpop.f32.mrf.mxu2  ;;  %v368_v20 = vadd.f32 1.0, %v360_v14  ;;  %v338_v22 = vpop.f32.mrf.mxu3 }
  0xbd   :  { %v1313_v21 = vadd.f32 %v324_v19, %v121_v10  ;;  %v298_v23 = vpop.f32.mrf.mxu0  ;;  %v1315_v24 = vadd.f32 %v338_v22, %v122_v12  ;;  %v312_v26 = vpop.f32.mrf.mxu1  ;;  %v375_v27 = vmul.f32 %v367_v17, %v343_v13 }
  0xbe   :  { %v1317_v25 = vadd.f32 %v298_v23, %v119_v60  ;;  %v313_v29 = vadd.f32 %v312_v26, %v120_v61  ;;  %v376_v30 = vmul.f32 %v368_v20, %v344_v18 }
  0xbf   :  { %v353_v28 = vmul.f32 %v1313_v21, %v1313_v21  ;;  %v354_v31 = vmul.f32 %v1315_v24, %v1315_v24  ;;  %1097 = vtanh.f32 %v375_v27  ;;  %v345_v36 = vmul.f32 0.7978846, %v1313_v21 }
  0xc0   :  { %v355_v33 = vmul.f32 %v1317_v25, %v1317_v25  ;;  %v356_v35 = vmul.f32 %v313_v29, %v313_v29  ;;  %1099 = vtanh.f32 %v376_v30  ;;  %v346_v39 = vmul.f32 0.7978846, %v1315_v24 }
  0xc1   :  { %v361_v32 = vmul.f32 0.044715, %v353_v28  ;;  %v362_v34 = vmul.f32 0.044715, %v354_v31  ;;  %v347_v44 = vmul.f32 0.7978846, %v1317_v25 }
  0xc2   :  { %v363_v38 = vmul.f32 0.044715, %v355_v33  ;;  %v364_v41 = vmul.f32 0.044715, %v356_v35  ;;  %v348_v48 = vmul.f32 0.7978846, %v313_v29 }
  0xc3   :  { %v369_v37 = vadd.f32 1.0, %v361_v32  ;;  %v370_v40 = vadd.f32 1.0, %v362_v34 }
  0xc4   :  { %v326_v42 = vpop.f32.mrf.mxu2  ;;  %v371_v45 = vadd.f32 1.0, %v363_v38  ;;  %v340_v47 = vpop.f32.mrf.mxu3  ;;  %v372_v49 = vadd.f32 1.0, %v364_v41 }
  0xc5   :  { %v377_v43 = vmul.f32 %v369_v37, %v345_v36  ;;  %v327_v46 = vadd.f32 %v326_v42, %v121_v10  ;;  %v341_v50 = vadd.f32 %v340_v47, %v122_v12  ;;  %v378_v51 = vmul.f32 %v370_v40, %v346_v39  ;;  %v1098_v55 = vpop.eup %1097  ;;  %v1096_v40 = vld [vmem:[%s1346_s4] ss:$0 sm:$0xff] }
  0xc6   :  { %v379_v52 = vmul.f32 %v371_v45, %v347_v44  ;;  %v380_v53 = vmul.f32 %v372_v49, %v348_v48  ;;  %v1100_v57 = vpop.eup %1099  ;;  %v391_v60 = vmul.f32 0.5, %v1098_v55 }
  0xc7   :  { %1101 = vtanh.f32 %v377_v43  ;;  %v357_v54 = vmul.f32 %v327_v46, %v327_v46  ;;  %v358_v56 = vmul.f32 %v341_v50, %v341_v50  ;;  %v349_v61 = vmul.f32 0.7978846, %v327_v46 }
  0xc8   :  { %1103 = vtanh.f32 %v379_v52  ;;  %v392_v63 = vmul.f32 0.5, %v1100_v57  ;;  %v350_v0 = vmul.f32 0.7978846, %v341_v50  ;;  %v399_v9 = vadd.f32 0.5, %v391_v60 }
  0xc9   :  { %1105 = vtanh.f32 %v380_v53  ;;  %v365_v58 = vmul.f32 0.044715, %v357_v54  ;;  %v366_v59 = vmul.f32 0.044715, %v358_v56 }
  0xca   :  { %1107 = vtanh.f32 %v378_v51  ;;  %v400_v12 = vadd.f32 0.5, %v392_v63  ;;  %v407_v17 = vmul.f32 %v399_v9, %v1301_v3 }
  0xcb   :  { %v373_v62 = vadd.f32 1.0, %v365_v58  ;;  %v374_v1 = vadd.f32 1.0, %v366_v59 }
  0xcc   :  { %v408_v20 = vmul.f32 %v400_v12, %v1303_v5 }
  0xcd   :  { %v1102_v2 = vpop.eup %1101  ;;  %v381_v4 = vmul.f32 %v373_v62, %v349_v61  ;;  %v382_v7 = vmul.f32 %v374_v1, %v350_v0 }
  0xce   :  { %v1104_v6 = vpop.eup %1103  ;;  %v393_v15 = vmul.f32 0.5, %v1102_v2 }
  0xcf   :  { %v1106_v8 = vpop.eup %1105  ;;  %v395_v10 = vmul.f32 0.5, %v1104_v6  ;;  %1109 = vtanh.f32 %v381_v4 }
  0xd0   :  { %v1108_v11 = vpop.eup %1107  ;;  %v396_v13 = vmul.f32 0.5, %v1106_v8  ;;  %1111 = vtanh.f32 %v382_v7  ;;  %v401_v28 = vadd.f32 0.5, %v393_v15 }
  0xd1   :  { %v403_v14 = vadd.f32 0.5, %v395_v10  ;;  %v394_v18 = vmul.f32 0.5, %v1108_v11 }
  0xd2   :  { %v404_v16 = vadd.f32 0.5, %v396_v13  ;;  %v409_v3 = vmul.f32 %v401_v28, %v1313_v21 }
  0xd3   :  { %v411_v19 = vmul.f32 %v403_v14, %v1317_v25  ;;  %v402_v32 = vadd.f32 0.5, %v394_v18 }
  0xd4   :  { %v412_v22 = vmul.f32 %v404_v16, %v313_v29 }
  0xd5   :  { %v1110_v23 = vpop.eup %1109  ;;  %v415_v26 = vpack.c.bf16 %v411_v19, %v407_v17  ;;  %v410_v25 = vmul.f32 %v402_v32, %v1315_v24 }
  0xd6   :  { %v1112_v27 = vpop.eup %1111  ;;  %v397_v30 = vmul.f32 0.5, %v1110_v23  ;;  %v416_v31 = vpack.c.bf16 %v412_v22, %v408_v20 }
  0xd7   :  { %v398_v33 = vmul.f32 0.5, %v1112_v27  ;;  %687 = vmatmul.bf16.vlgmr.msrb.gmra.mxu0 %v415_v26 }
  0xd8   :  { %v405_v34 = vadd.f32 0.5, %v397_v30  ;;  %701 = vmatmul.bf16.vlgmr.msrb.gmra.mxu1 %v416_v31 }
  0xd9   :  { %v406_v35 = vadd.f32 0.5, %v398_v33 }
  0xda   :  { %v413_v36 = vmul.f32 %v405_v34, %v327_v46 }
  0xdb   :  { %v414_v37 = vmul.f32 %v406_v35, %v341_v50 }
  0xdc   :  { %v417_v5 = vpack.c.bf16 %v413_v36, %v409_v3 }
  0xdd   :  { %v418_v29 = vpack.c.bf16 %v414_v37, %v410_v25 }
  0xde   :  { %715 = vmatmul.bf16.vlgmr.msrb.gmra.mxu2 %v417_v5 }
  0xdf   :  { %729 = vmatmul.bf16.vlgmr.msrb.gmra.mxu3 %v418_v29 }
 0x154   :  { %v688_v38 = vpop.f32.mrf.mxu0 }
 0x155   :  { %v702_v39 = vpop.f32.mrf.mxu1  ;;  %v689_v43 = vadd.f32 %v1096_v40, %v688_v38 }
 0x157   :  { %v703_v21 = vadd.f32 %v702_v39, %v689_v43 }
 0x15c   :  { %v690_v41 = vpop.f32.mrf.mxu0 }
 0x15d   :  { %v691_v45 = vadd.f32 %v1096_v40, %v690_v41  ;;  %v704_v46 = vpop.f32.mrf.mxu1 }
 0x15f   :  { %v705_v47 = vadd.f32 %v704_v46, %v691_v45 }
 0x161   :  { %v716_v42 = vpop.f32.mrf.mxu2 }
 0x162   :  { %v730_v44 = vpop.f32.mrf.mxu3  ;;  %v717_v24 = vadd.f32 %v716_v42, %v703_v21 }
 0x164   :  { %v731_v51 = vadd.f32 %v730_v44, %v717_v24 }
 0x169   :  { %v718_v48 = vpop.f32.mrf.mxu2 }
 0x16a   :  { %v719_v49 = vadd.f32 %v718_v48, %v705_v47  ;;  %v732_v50 = vpop.f32.mrf.mxu3 }
 0x16c   :  { %v733_v52 = vadd.f32 %v732_v50, %v719_v49 }
 0x16e   :  { %v1083_v53 = vpack.c.bf16 %v733_v52, %v731_v51 }
 0x170   :  { %1084 = vst [vmem:[#allocation10] sm:$0xff] %v1083_v53  }
 0x171   :  { %751 = dma.vmem_to_hbm [thread:$0]  %s744_s18, 128, %s746_s21, [#allocation4], %s1249_s15, %s1249_s15, %s1250_s16  }
 0x172   :  { %1239 = dma.done.wait [#allocation4], 128  }
 0x173   :  { %1240 = vsyncadd [#allocation4], 4294967168 }
 0x174   :  { %756 = vsyncpa [#allocation3], 1 }
 0x175   :  { %757 = vsyncpa [#allocation6], 1 }
 0x176   :  { %758 = vsyncpa [#allocation9], 1 }
 0x177   :  { %759 = vsyncpa [#allocation4], 1 }

</bundles_post_ra>
